<compile_context>
chip_gen: v7x
topology: tpu7x:2x2x1
jax: 0.10.0
libtpu: 0.0.40
codegen_flags: <defaults>
</compile_context>

<pallas_src>
import jax
import jax.numpy as jnp
from jax.experimental import pallas as pl
from jax.experimental.pallas import tpu as pltpu


def _decode_batched_kernel(x_ref, w_ref, b_ref, o_ref):
    # x_ref: (Bt, tn, K)  activation tile (native dtype)
    # w_ref: (O, K)       weights, VMEM-resident across the whole grid
    # b_ref: (O, 1)       bias (f32), VMEM-resident
    # o_ref: (Bt, O, tn)  output tile, N on the lane axis (lane-dense stores)
    w = w_ref[...].astype(x_ref.dtype)        # tiny in-kernel cast, zero HBM cost
    b = b_ref[...]
    for i in range(x_ref.shape[0]):           # small static unroll (Bt <= 16)
        acc = jax.lax.dot_general(
            w, x_ref[i],
            dimension_numbers=(((1,), (1,)), ((), ())),   # contract K with K -> (O, tn)
            preferred_element_type=jnp.float32)
        o_ref[i] = (acc + b).astype(o_ref.dtype)


def _decode_flat_kernel(x_ref, w_ref, b_ref, o_ref):
    # Small-N path: batch folded into the lane axis.
    # x_ref: (tm, K), w_ref: (O, K), b_ref: (O, 1), o_ref: (O, tm)
    w = w_ref[...].astype(x_ref.dtype)
    acc = jax.lax.dot_general(
        w, x_ref[...],
        dimension_numbers=(((1,), (1,)), ((), ())),
        preferred_element_type=jnp.float32)
    o_ref[...] = (acc + b_ref[...]).astype(o_ref.dtype)


def decoding_layer_forward(feat, weight, bias, *, out_dtype=None,
                           n_tile=4096, target_step_bytes=1 << 20,
                           max_batch_block=16):
    """AGCRN DecodingLayer forward.

    feat:   (B, 1, N, in_feats)  NCHW input of nn.Conv2d(1, O, (1, in_feats))
    weight: (O, 1, 1, in_feats)
    bias:   (O,)
    Returns (B, O, N, 1), identical layout/semantics to the PyTorch module.
    Activations are consumed in their native dtype; accumulation is f32.
    """
    B, C, N, K = feat.shape
    assert C == 1
    O = weight.shape[0]
    if out_dtype is None:
        out_dtype = feat.dtype

    x3 = feat.reshape(B, N, K)                    # free view, native dtype (no extra HBM pass)
    w = weight.reshape(O, K)                      # tiny, stays resident in VMEM
    b2 = bias.reshape(O, 1).astype(jnp.float32)   # (O, 1) broadcasts over the lane axis

    x_bytes = jnp.dtype(x3.dtype).itemsize
    o_bytes = jnp.dtype(out_dtype).itemsize

    cost = pl.CostEstimate(
        flops=2 * B * N * K * O,
        transcendentals=0,
        bytes_accessed=(B * N * K * x_bytes
                        + O * K * jnp.dtype(w.dtype).itemsize
                        + O * 4
                        + B * O * N * o_bytes),
    )

    if N < 128:
        # ---- Small-N path: fold batch into the node axis (lane-dense stores). ----
        M = B * N
        x2 = x3.reshape(M, K)                     # free view
        if M < 128 or M % 128 == 0:
            tm = min(n_tile, M)
        else:
            tm = min(n_tile, (M // 128) * 128)    # ragged last tile: OOB stores dropped
        out_flat = pl.pallas_call(
            _decode_flat_kernel,
            out_shape=jax.ShapeDtypeStruct((O, M), out_dtype),
            grid_spec=pltpu.PrefetchScalarGridSpec(
                num_scalar_prefetch=0,
                grid=(pl.cdiv(M, tm),),
                in_specs=[
                    pl.BlockSpec((tm, K), lambda mi: (mi, 0)),
                    pl.BlockSpec((O, K), lambda mi: (0, 0)),   # VMEM-resident
                    pl.BlockSpec((O, 1), lambda mi: (0, 0)),   # VMEM-resident
                ],
                out_specs=pl.BlockSpec((O, tm), lambda mi: (0, mi)),
            ),
            compiler_params=pltpu.CompilerParams(
                dimension_semantics=("parallel",)),
            cost_estimate=cost,
        )(x2, w, b2)
        # (O, B*N) -> (B, O, N, 1); tiny transpose, only taken when N is small.
        return jnp.transpose(out_flat.reshape(O, B, N), (1, 0, 2))[..., None]

    # ---- General path: direct (B, O, N) layout, N on the lane axis. ----
    if N % 128 == 0:
        tn = min(n_tile, N)
    else:
        tn = min(n_tile, max(128, (N // 128) * 128))   # ragged last N tile allowed

    # Block several batches per step so each step moves ~target_step_bytes of HBM.
    per_batch_step_bytes = tn * (K * x_bytes + O * o_bytes)
    bt_desired = int(max(1, min(max_batch_block,
                                target_step_bytes // per_batch_step_bytes)))
    bt = max(d for d in range(1, min(B, bt_desired) + 1) if B % d == 0)

    # Keep at least two parallel grid chunks for non-trivial problems (v7x: 2 TCs).
    total_bytes = B * N * (K * x_bytes + O * o_bytes)
    if (B // bt) * pl.cdiv(N, tn) < 2 and total_bytes > 2 * target_step_bytes:
        if tn >= 256:
            tn = (tn // 2 // 128) * 128
        elif bt > 1:
            bt = max(d for d in range(1, bt) if B % d == 0)

    out = pl.pallas_call(
        _decode_batched_kernel,
        out_shape=jax.ShapeDtypeStruct((B, O, N), out_dtype),
        grid_spec=pltpu.PrefetchScalarGridSpec(
            num_scalar_prefetch=0,
            grid=(B // bt, pl.cdiv(N, tn)),
            in_specs=[
                pl.BlockSpec((bt, tn, K), lambda bi, ni: (bi, ni, 0)),
                pl.BlockSpec((O, K), lambda bi, ni: (0, 0)),   # VMEM-resident
                pl.BlockSpec((O, 1), lambda bi, ni: (0, 0)),   # VMEM-resident
            ],
            out_specs=pl.BlockSpec((bt, O, tn), lambda bi, ni: (bi, 0, ni)),
        ),
        compiler_params=pltpu.CompilerParams(
            dimension_semantics=("parallel", "parallel")),
        cost_estimate=cost,
    )(x3, w, b2)

    # (B, O, N) -> NCHW (B, O, N, 1): trailing unit dim, no data movement.
    return out[..., None]


def _reference(feat, weight, bias):
    B, _, N, K = feat.shape
    O = weight.shape[0]
    ref = (feat.reshape(B * N, K) @ weight.reshape(O, K).T + bias[None, :])
    return ref.reshape(B, N, O).transpose(0, 2, 1)[..., None]


if __name__ == "__main__":
    # Small, module-consistent shapes.
    B = 2              # batch
    N = 16             # num nodes (H axis of the conv input)
    in_feats = 32      # hidden size consumed by the conv kernel (W axis)
    out_feats = 4
    num_timesteps_out = 8
    O = num_timesteps_out * out_feats

    key = jax.random.PRNGKey(0)
    k_feat, k_w, k_b = jax.random.split(key, 3)

    # Deterministic parameter init (Conv2d(1, O, kernel_size=(1, in_feats))).
    fan_in = 1 * 1 * in_feats
    bound = 1.0 / (fan_in ** 0.5)
    weight = jax.random.uniform(k_w, (O, 1, 1, in_feats), jnp.float32,
                                minval=-bound, maxval=bound)
    bias = jax.random.uniform(k_b, (O,), jnp.float32,
                              minval=-bound, maxval=bound)

    # Path 1: small N (batch folded into the lane axis).
    feat_small = jax.random.normal(k_feat, (B, 1, N, in_feats), jnp.float32)
    out_small = decoding_layer_forward(feat_small, weight, bias)
    jax.block_until_ready(out_small)
    ref_small = _reference(feat_small, weight, bias)
    assert out_small.shape == (B, O, N, 1)
    assert out_small.dtype == feat_small.dtype
    assert jnp.allclose(out_small, ref_small, atol=1e-2, rtol=1e-2)

    # Path 2: N >= 128 (direct lane-dense (B, O, N) layout, batched grid steps).
    N_big = 128
    feat_big = jax.random.normal(k_feat, (B, 1, N_big, in_feats), jnp.float32)
    out_big = decoding_layer_forward(feat_big, weight, bias)
    jax.block_until_ready(out_big)
    ref_big = _reference(feat_big, weight, bias)
    assert out_big.shape == (B, O, N_big, 1)
    assert out_big.dtype == feat_big.dtype
    assert jnp.allclose(out_big, ref_big, atol=1e-2, rtol=1e-2)

    print("KERNEL_OK")
</pallas_src>

<mosaic_0001>
module attributes {stable_mosaic.version = 11 : i64} {
  func.func @_decode_flat_kernel(%arg0: i32, %arg1: memref<32x32xf32, #tpu.memory_space<vmem>>, %arg2: memref<32x32xf32, #tpu.memory_space<vmem>>, %arg3: memref<32x1xf32, #tpu.memory_space<vmem>>, %arg4: memref<32x32xf32, #tpu.memory_space<vmem>>) attributes {dimension_semantics = [#tpu.dimension_semantics<parallel>], iteration_bounds = array<i64: 1>, scalar_prefetch = 0 : i64, scratch_operands = 0 : i64, tpu.core_type = #tpu.core_type<tc>, window_params = [{transform_indices = @transform_0, window_bounds = array<i64: 32, 32>}, {pipeline_mode = #tpu.pipeline_mode<synchronous>, transform_indices = @transform_1, window_bounds = array<i64: 32, 32>}, {pipeline_mode = #tpu.pipeline_mode<synchronous>, transform_indices = @transform_2, window_bounds = array<i64: 32, 1>}, {transform_indices = @transform_3, window_bounds = array<i64: 32, 32>}]} {
    %c0 = arith.constant 0 : index
    %c0_0 = arith.constant 0 : index
    %0 = vector.load %arg2[%c0, %c0_0] : memref<32x32xf32, #tpu.memory_space<vmem>>, vector<32x32xf32>
    %c0_1 = arith.constant 0 : index
    %c0_2 = arith.constant 0 : index
    %1 = vector.load %arg1[%c0_1, %c0_2] : memref<32x32xf32, #tpu.memory_space<vmem>>, vector<32x32xf32>
    %cst = arith.constant dense<0.000000e+00> : vector<32x32xf32>
    %2 = tpu.matmul %0, %1, %cst {dimension_numbers = #tpu.dot_dimension_numbers<[1], [1], [0], [0], [0, 0, 1, 0], [], []>} : vector<32x32xf32>, vector<32x32xf32>, vector<32x32xf32> -> vector<32x32xf32>
    %c0_3 = arith.constant 0 : index
    %c0_4 = arith.constant 0 : index
    %3 = vector.load %arg3[%c0_3, %c0_4] : memref<32x1xf32, #tpu.memory_space<vmem>>, vector<32x1xf32>
    %4 = vector.broadcast %3 : vector<32x1xf32> to vector<32x32xf32>
    %5 = arith.addf %2, %4 : vector<32x32xf32>
    %c0_5 = arith.constant 0 : index
    %c0_6 = arith.constant 0 : index
    %6 = vector.load %arg4[%c0_5, %c0_6] : memref<32x32xf32, #tpu.memory_space<vmem>>, vector<32x32xf32>
    tpu.vector_store %arg4[%c0_5, %c0_6], %5 {strides = array<i32>} : memref<32x32xf32, #tpu.memory_space<vmem>>, vector<32x32xf32>,
    return
  }
  func.func @transform_0(%arg0: i32) -> (i32, i32) {
    %c0_i32 = arith.constant 0 : i32
    %c0_i32_0 = arith.constant 0 : i32
    return %arg0, %c0_i32 : i32, i32
  }
  func.func @transform_1(%arg0: i32) -> (i32, i32) {
    %c0_i32 = arith.constant 0 : i32
    %c0_i32_0 = arith.constant 0 : i32
    %c0_i32_1 = arith.constant 0 : i32
    return %c0_i32, %c0_i32_0 : i32, i32
  }
  func.func @transform_2(%arg0: i32) -> (i32, i32) {
    %c0_i32 = arith.constant 0 : i32
    %c0_i32_0 = arith.constant 0 : i32
    %c0_i32_1 = arith.constant 0 : i32
    return %c0_i32, %c0_i32_0 : i32, i32
  }
  func.func @transform_3(%arg0: i32) -> (i32, i32) {
    %c0_i32 = arith.constant 0 : i32
    %c0_i32_0 = arith.constant 0 : i32
    return %c0_i32, %arg0 : i32, i32
  }
}

</mosaic_0001>

<bundles_post_ra>
// kernel: tpu_custom_call.1
= control target key start
LH: loop header
LB: loop body
LE: loop exit
PB: predicated region body
PF: predicated region fallthrough
CT: control target
= control target key end

     0   :  { %8 = vsyncpa [#allocation3], 0  ;;  %s402_s0 = inlined_call_operand.vmem [shape: f32[32,32], index: 0, kind: input, shape index: {}]   ;;  %s403_s1 = inlined_call_operand.hbm [shape: f32[32,32], index: 1, kind: input, shape index: {}]   ;;  %s404_s2 = inlined_call_operand.vmem [shape: f32[32,1], index: 2, kind: input, shape index: {}]   ;;  %s405_s3 = inlined_call_operand.hbm [shape: f32[32,32], index: 3, kind: output, shape index: {}]  }
   0x1   :  { %9 = vsyncpa [#allocation4], 0  ;;  %s293_s12 = smov [#allocation2]   ;;  %s245_s16 = scalar_lea.hbm %s403_s1, 512 }
   0x2   :  { %s17_s13 = sshll.u32 %s293_s12, 4  ;;  %p246_p0 = scmp.ne.s32.totalorder %s403_s1, %s245_s16  ;;  %s18_s13 = int_to_ptr.vmem [resolvable:$true] %s17_s13 }
   0x3   :  { %p249_p1 = scmp.lt.u32.totalorder %s245_s16, %s403_s1 }
   0x5   :  { %p251_p2 = pnand %p249_p1, %p246_p0 }
   0x7   :  { %254 = shalt.err (!%p251_p2)
}
   0x8   :  { %s255_s21 = scalar_lea.vmem %s18_s13, 512  ;;  %p260_p4 = scmp.lt.s32.totalorder %s18_s13, %s18_s13 }
   0x9   :  { %p256_p3 = scmp.ne.s32.totalorder %s18_s13, %s255_s21  ;;  %p261_p5 = scmp.lt.s32.totalorder %s255_s21, %s255_s21 }
   0xb   :  { %p262_p6 = por %p261_p5, %p260_p4 }
   0xd   :  { %p263_p7 = pnand %p262_p6, %p256_p3 }
   0xf   :  { %266 = shalt.err (!%p263_p7)
}
  0x10   :  { %s294_s22 = smov 128   ;;  %s295_s23 = smov 8  }
  0x11   :  { %23 = dma.hbm_to_vmem [thread:$0]  %s403_s1, 512, %s18_s13, [#allocation3], %s294_s22, %s294_s22, %s295_s23  }
  0x12   :  { %289 = dma.done.wait [#allocation3], 512  }
  0x13   :  { %290 = vsyncadd [#allocation3], 4294966784  ;;  %v296_v0 = vmov 0   ;;  %vm61_vm0 = vcmask 261120   ;;  %v33_v2 = vld [vmem:[%s402_s0] sm:$0xff]  ;;  %v34_v3 = vld [vmem:[%s402_s0 + $0x8] sm:$0xff] }
  0x14   :  { %244 = vset.pattern.permute.xlu1 %v296_v0  ;;  %243 = vset.pattern.permute.xlu0 %v296_v0  ;;  %vm335_vm1 = vmpackc.low %vm61_vm0, %vm61_vm0  ;;  %v35_v4 = vld [vmem:[%s402_s0 + $0x10] sm:$0xff]  ;;  %v222_v5 = vpack.c.bf16 %v34_v3, %v33_v2  ;;  %v36_v6 = vld [vmem:[%s402_s0 + $0x18] sm:$0xff]  ;;  %s297_s13 = smov [#allocation5]  }
  0x15   :  { %v29_v7 = vld [vmem:[#allocation2] sm:$0xff]  ;;  %v31_v8 = vld [vmem:[#allocation2 + $0x10] sm:$0xff]  ;;  %v228_v9 = vpack.c.bf16 %v36_v6, %v35_v4  ;;  %v40_v12 = vld [vmem:[%s404_s2 + $0x18] sm:$0xff] }
  0x16   :  { %216 = vmatprep.mubr.msk.f32.mxu0 %vm61_vm0, %v29_v7  ;;  %219 = vmatprep.mubr.msk.f32.mxu1 %vm61_vm0, %v31_v8  ;;  %v39_v10 = vld [vmem:[%s404_s2 + $0x10] sm:$0xff]  ;;  %v37_v11 = vld [vmem:[%s404_s2] sm:$0xff]  ;;  %v38_v13 = vld [vmem:[%s404_s2 + $0x8] sm:$0xff]  ;;  %s180_s2 = sshll.u32 %s297_s13, 4  ;;  %s181_s2 = int_to_ptr.vmem [resolvable:$true] %s180_s2 }
  0x17   :  { %224 = vmatprep.subr.msk.bf16.mxu0 %vm335_vm1, %v222_v5  ;;  %234 = vmatprep.subr.msk.bf16.mxu1 %vm335_vm1, %v222_v5  ;;  %v30_v14 = vld [vmem:[#allocation2 + $0x8] sm:$0xff]  ;;  %v32_v15 = vld [vmem:[#allocation2 + $0x18] sm:$0xff]  ;;  %s267_s14 = scalar_lea.vmem %s181_s2, 512  ;;  %p272_p9 = scmp.lt.s32.totalorder %s181_s2, %s181_s2 }
  0x18   :  { %227 = vmatpush3.bf16.xpose.msk.msra.mxu0 %vm335_vm1, %v222_v5  ;;  %236 = vmatpush3.bf16.xpose.msk.msra.mxu1 %vm335_vm1, %v222_v5  ;;  %p268_p8 = scmp.ne.s32.totalorder %s181_s2, %s267_s14  ;;  %p273_p10 = scmp.lt.s32.totalorder %s267_s14, %s267_s14 }
  0x19   :  { %230 = vmatprep.subr.msk.bf16.mxu0 %vm335_vm1, %v228_v9  ;;  %235 = vmatprep.subr.msk.bf16.mxu1 %vm335_vm1, %v228_v9 }
  0x1a   :  { %53 = vperm.xlu1 %244, %v39_v10   ;;  %43 = vperm.xlu0 %243, %v37_v11   ;;  %p274_p11 = por %p273_p10, %p272_p9 }
  0x1c   :  { %p275_p12 = pnand %p274_p11, %p268_p8 }
  0x1e   :  { %58 = vperm.xlu1 %244, %v40_v12   ;;  %48 = vperm.xlu0 %243, %v38_v13  }
  0x20   :  { %233 = vmatpush3.bf16.xpose.msk.msra.mxu0 %vm335_vm1, %v228_v9  ;;  %237 = vmatpush3.bf16.xpose.msk.msra.mxu1 %vm335_vm1, %v228_v9 }
  0x27   :  { %217 = vmatmul.mubr.msk.f32.vlgmr.msra.gmra.mrb[0].mxu0 %vm61_vm0, %v30_v14  ;;  %220 = vmatmul.mubr.msk.f32.vlgmr.msra.gmra.mrb[0].mxu1 %vm61_vm0, %v32_v15 }
  0x99   :  { %v54_v16 = vpop.permute.xlu1 %53  ;;  %v44_v17 = vpop.permute.xlu0 %43 }
  0x9d   :  { %v59_v18 = vpop.permute.xlu1 %58  ;;  %v49_v19 = vpop.permute.xlu0 %48 }
  0xfa   :  { %v218_v20 = vpop.f32.mrb[0].mxu0  ;;  %v221_v21 = vpop.f32.mrb[0].mxu1 }
  0xfb   :  { %v158_v22 = vadd.f32 %v218_v20, %v49_v19  ;;  %v168_v23 = vadd.f32 %v221_v21, %v59_v18  ;;  %v152_v24 = vpop.f32.mrb[1].mxu0  ;;  %v162_v25 = vpop.f32.mrb[1].mxu1 }
  0xfc   :  { %v153_v26 = vadd.f32 %v152_v24, %v44_v17  ;;  %v163_v27 = vadd.f32 %v162_v25, %v54_v16 }
  0xfd   :  { %172 = vst.msk [vmem:[#allocation5 + $0x8] sm:$0xff] %vm61_vm0, %v158_v22  ;;  %174 = vst.msk [vmem:[#allocation5 + $0x18] sm:$0xff] %vm61_vm0, %v168_v23 }
  0xfe   :  { %171 = vst.msk [vmem:[#allocation5] sm:$0xff] %vm61_vm0, %v153_v26  ;;  %173 = vst.msk [vmem:[#allocation5 + $0x10] sm:$0xff] %vm61_vm0, %v163_v27 }
  0xff   :  { %278 = shalt.err (!%p275_p12)
}
 0x100   :  { %s279_s17 = scalar_lea.hbm %s405_s3, 512 }
 0x101   :  { %p280_p13 = scmp.ne.s32.totalorder %s405_s3, %s279_s17  ;;  %p283_p0 = scmp.lt.u32.totalorder %s279_s17, %s405_s3 }
 0x103   :  { %p285_p1 = pnand %p283_p0, %p280_p13 }
 0x105   :  { %288 = shalt.err (!%p285_p1)
}
 0x106   :  { %186 = dma.vmem_to_hbm [thread:$0]  %s181_s2, 512, %s405_s3, [#allocation4], %s294_s22, %s294_s22, %s295_s23  }
 0x107   :  { %291 = dma.done.wait [#allocation4], 512  }
 0x108   :  { %292 = vsyncadd [#allocation4], 4294966784 }
 0x109   :  { %190 = vsyncpa [#allocation3], 1 }
 0x10a   :  { %191 = vsyncpa [#allocation4], 1 }

</bundles_post_ra>
